<compile_context>
chip_gen: v6e
topology: v6e:2x2x1
jax: 0.10.0
libtpu: 0.0.40
codegen_flags: <defaults>
</compile_context>

<pallas_src>
import functools

import jax
import jax.numpy as jnp
from jax import lax
from jax.experimental import pallas as pl
from jax.experimental.pallas import tpu as pltpu

# ---------------- small DeepSeek-V2-like config ----------------
HIDDEN = 64
NUM_HEADS = 2
Q_LORA = 32
KV_LORA = 32
QK_NOPE = 32
QK_ROPE = 16
V_HEAD = 32
QK_HEAD = QK_NOPE + QK_ROPE           # 48
SCALING = QK_HEAD ** (-0.5)
EPS = 1e-6
ROPE_THETA = 10000.0

BATCH = 2
SEQ = 8


# ---------------- fused Pallas kernel ----------------
def _mla_fused_kernel(x_ref, wqa_ref, qaln_ref, wqb_ref, wkva_ref, kvaln_ref,
                      wkvb_ref, wo_ref, cosq_ref, sinq_ref,
                      out_ref, attnw_ref, *,
                      eps, batch, seq, num_heads, kv_lora, qk_nope, qk_rope,
                      v_head, hidden):
    f32 = jnp.float32
    bf16 = jnp.bfloat16
    bs = batch * seq
    pe_all = num_heads * qk_rope
    nope_all = num_heads * qk_nope

    x = x_ref[...]                                                   # (BS, HID) bf16

    def rms(v, w):                                                   # f32 in / f32 out
        var = jnp.mean(v * v, axis=-1, keepdims=True)
        return v * lax.rsqrt(var + eps) * w

    # ---- query low-rank path (attention SCALING already folded into wqb) ----
    q_a = jnp.dot(x, wqa_ref[...], preferred_element_type=f32)       # (BS, Q_LORA) f32
    q_a = rms(q_a, qaln_ref[...]).astype(bf16)
    q = jnp.dot(q_a, wqb_ref[...], preferred_element_type=f32)       # (BS, H*NOPE + H*ROPE)
    q_nope_all = q[:, :nope_all]
    q_pe_all = q[:, nope_all:]                                       # (BS, H*ROPE)

    # ---- key/value low-rank path ----
    ckv = jnp.dot(x, wkva_ref[...], preferred_element_type=f32)      # (BS, KV_LORA+ROPE)
    k_c = rms(ckv[:, :kv_lora], kvaln_ref[...]).astype(bf16)
    k_pe = ckv[:, kv_lora:]                                          # (BS, ROPE) f32
    kv = jnp.dot(k_c, wkvb_ref[...], preferred_element_type=f32)     # (BS, H*NOPE + H*V)
    k_nope_all = kv[:, :nope_all]
    v_all = kv[:, nope_all:]

    # ---- rotary: out = x*cos + (x @ SWAP)*sin  (interleaved complex multiply) ----
    # SWAP is the pair-swap matrix (x0,x1,...) -> (-x1,x0,...); one batched matmul
    # covers all q heads, one small matmul covers the shared k_pe.
    r_i = lax.broadcasted_iota(jnp.int32, (pe_all, pe_all), 0)
    c_i = lax.broadcasted_iota(jnp.int32, (pe_all, pe_all), 1)
    swap = (jnp.where((r_i == c_i + 1) & ((c_i % 2) == 0), -1.0, 0.0)
            + jnp.where((c_i == r_i + 1) & ((r_i % 2) == 0), 1.0, 0.0)).astype(bf16)
    cos_q = cosq_ref[...]                                            # (BS, H*ROPE) f32
    sin_q = sinq_ref[...]
    q_pe_rot = q_pe_all * cos_q + jnp.dot(
        q_pe_all.astype(bf16), swap, preferred_element_type=f32) * sin_q
    k_pe_rot = k_pe * cos_q[:, :qk_rope] + jnp.dot(
        k_pe.astype(bf16), swap[:qk_rope, :qk_rope],
        preferred_element_type=f32) * sin_q[:, :qk_rope]
    k_pe_rot_b = k_pe_rot.astype(bf16)                               # shared across heads

    # ---- block-diagonal causal mask over the flattened batch*seq axis ----
    ri = lax.broadcasted_iota(jnp.int32, (bs, bs), 0)
    ci = lax.broadcasted_iota(jnp.int32, (bs, bs), 1)
    same_batch = jnp.zeros((bs, bs), jnp.bool_)
    for b in range(batch):                                           # comparisons only
        in_r = (ri >= b * seq) & (ri < (b + 1) * seq)
        in_c = (ci >= b * seq) & (ci < (b + 1) * seq)
        same_batch = same_batch | (in_r & in_c)
    mask = jnp.where(same_batch & (ri >= ci), 0.0, -1e9).astype(f32)

    # ---- attention core: one (BS, BS) score matmul per head, o_proj accumulated in vregs
    wo = wo_ref[...]                                                 # (H*V, HID) bf16
    dn = (((1,), (1,)), ((), ()))      # contract last dims -> QK^T without transposing K
    out_acc = jnp.zeros((bs, hidden), f32)
    for h in range(num_heads):
        qn = q_nope_all[:, h * qk_nope:(h + 1) * qk_nope].astype(bf16)
        kn = k_nope_all[:, h * qk_nope:(h + 1) * qk_nope].astype(bf16)
        qp = q_pe_rot[:, h * qk_rope:(h + 1) * qk_rope].astype(bf16)
        vh = v_all[:, h * v_head:(h + 1) * v_head].astype(bf16)

        s = lax.dot_general(qn, kn, dn, preferred_element_type=f32)
        s = s + lax.dot_general(qp, k_pe_rot_b, dn, preferred_element_type=f32)
        s = s + mask                                                 # (BS, BS)

        m = jnp.max(s, axis=-1, keepdims=True)
        p = jnp.exp(s - m)
        p = p / jnp.sum(p, axis=-1, keepdims=True)                   # exact (exported)
        attnw_ref[:, h * bs:(h + 1) * bs] = p                        # lane-dense slab

        o_h = jnp.dot(p.astype(bf16), vh, preferred_element_type=f32)  # (BS, V_HEAD)
        out_acc = out_acc + jnp.dot(o_h.astype(bf16),
                                    wo[h * v_head:(h + 1) * v_head, :],
                                    preferred_element_type=f32)
    out_ref[...] = out_acc


def prepare_params(params):
    """Pre-transpose to (K, N), permute head columns, fold SCALING, cast to bf16 once."""
    bf16 = jnp.bfloat16
    # q_b output columns [h: nope|rope] -> [all-heads nope | all-heads rope]
    qcols = jnp.arange(NUM_HEADS * QK_HEAD).reshape(NUM_HEADS, QK_HEAD)
    perm_q = jnp.concatenate([qcols[:, :QK_NOPE].reshape(-1),
                              qcols[:, QK_NOPE:].reshape(-1)])
    # kv_b output columns [h: nope|v] -> [all-heads nope | all-heads v]
    kvcols = jnp.arange(NUM_HEADS * (QK_NOPE + V_HEAD)).reshape(NUM_HEADS, QK_NOPE + V_HEAD)
    perm_kv = jnp.concatenate([kvcols[:, :QK_NOPE].reshape(-1),
                               kvcols[:, QK_NOPE:].reshape(-1)])
    return {
        "wqa": params["q_a_proj"].T.astype(bf16),                     # (HID, Q_LORA)
        "qaln": params["q_a_ln"].reshape(1, -1).astype(jnp.float32),  # (1, Q_LORA)
        "wqb": (params["q_b_proj"] * SCALING).T[:, perm_q].astype(bf16),
        "wkva": params["kv_a_proj"].T.astype(bf16),                   # (HID, KV_LORA+ROPE)
        "kvaln": params["kv_a_ln"].reshape(1, -1).astype(jnp.float32),
        "wkvb": params["kv_b_proj"].T[:, perm_kv].astype(bf16),
        "wo": params["o_proj"].T.astype(bf16),                        # (H*V, HID)
    }


def deepseek_v2_attention_forward(prep, hidden_states, cos, sin):
    """hidden_states: (B, S, HID); cos/sin: (B, S, QK_ROPE//2). Returns (out, attn_w)."""
    B, S, hid = hidden_states.shape
    BS = B * S
    x2d = hidden_states.reshape(BS, hid).astype(jnp.bfloat16)
    # duplicate each cos/sin over its (real, imag) pair, then tile over heads
    cos_full = jnp.repeat(cos.reshape(BS, QK_ROPE // 2), 2, axis=-1).astype(jnp.float32)
    sin_full = jnp.repeat(sin.reshape(BS, QK_ROPE // 2), 2, axis=-1).astype(jnp.float32)
    cos_q = jnp.tile(cos_full, (1, NUM_HEADS))                        # (BS, H*ROPE)
    sin_q = jnp.tile(sin_full, (1, NUM_HEADS))

    kernel = functools.partial(
        _mla_fused_kernel, eps=EPS, batch=B, seq=S, num_heads=NUM_HEADS,
        kv_lora=KV_LORA, qk_nope=QK_NOPE, qk_rope=QK_ROPE, v_head=V_HEAD, hidden=hid)

    def full(shape):
        return pl.BlockSpec(shape, lambda i, _n=len(shape): (0,) * _n)

    # TODO(synk): at non-toy sizes, tile the token dim with a ("parallel", ...) grid so the
    # activation stream double-buffers (and the 2nd v7x TensorCore is used); at these shapes
    # everything fits resident in VMEM and a single grid step is latency-optimal.
    out2d, attn_slab = pl.pallas_call(
        kernel,
        out_shape=(
            jax.ShapeDtypeStruct((BS, hid), jnp.float32),
            jax.ShapeDtypeStruct((BS, NUM_HEADS * BS), jnp.float32),
        ),
        grid=(1,),
        in_specs=[
            full((BS, hid)),
            full((hid, Q_LORA)),
            full((1, Q_LORA)),
            full((Q_LORA, NUM_HEADS * QK_HEAD)),
            full((hid, KV_LORA + QK_ROPE)),
            full((1, KV_LORA)),
            full((KV_LORA, NUM_HEADS * (QK_NOPE + V_HEAD))),
            full((NUM_HEADS * V_HEAD, hid)),
            full((BS, NUM_HEADS * QK_ROPE)),
            full((BS, NUM_HEADS * QK_ROPE)),
        ],
        out_specs=(
            full((BS, hid)),
            full((BS, NUM_HEADS * BS)),
        ),
        compiler_params=pltpu.CompilerParams(dimension_semantics=("arbitrary",)),
    )(x2d, prep["wqa"], prep["qaln"], prep["wqb"], prep["wkva"],
      prep["kvaln"], prep["wkvb"], prep["wo"], cos_q, sin_q)

    out = out2d.reshape(B, S, hid)
    # pull the per-batch diagonal blocks out of the block-diagonal attention slab
    attn = attn_slab.reshape(B, S, NUM_HEADS, B, S)
    bidx = jnp.arange(B)
    attn_w = attn[bidx, :, :, bidx, :]            # (B, S, H, S)
    attn_w = attn_w.transpose(0, 2, 1, 3)         # (B, H, S, S)
    return out, attn_w


# ---------------- pure-jnp reference (same math, no Pallas, f32) ----------------
def apply_rotary(x, cos, sin):
    """x: (B, Hx, S, D) interleaved (real, imag) pairs; cos/sin: (B, S, D//2)."""
    xr = x[..., 0::2]
    xi = x[..., 1::2]
    c = cos[:, None, :, :]
    s = sin[:, None, :, :]
    out_r = xr * c - xi * s
    out_i = xr * s + xi * c
    return jnp.stack([out_r, out_i], axis=-1).reshape(x.shape)


def reference_forward(params, hidden_states, cos, sin):
    B, S, hid = hidden_states.shape
    x2d = hidden_states.reshape(B * S, hid)

    def rms(x, w):
        var = jnp.mean(x * x, axis=-1, keepdims=True)
        return x * jax.lax.rsqrt(var + EPS) * w

    q_a = x2d @ params["q_a_proj"].T
    q = rms(q_a, params["q_a_ln"]) @ params["q_b_proj"].T
    q = q.reshape(B, S, NUM_HEADS, QK_HEAD).transpose(0, 2, 1, 3)
    q_nope, q_pe = q[..., :QK_NOPE], q[..., QK_NOPE:]

    ckv = x2d @ params["kv_a_proj"].T
    k_c, k_pe = ckv[:, :KV_LORA], ckv[:, KV_LORA:]
    kv = rms(k_c, params["kv_a_ln"]) @ params["kv_b_proj"].T
    kv = kv.reshape(B, S, NUM_HEADS, QK_NOPE + V_HEAD).transpose(0, 2, 1, 3)
    k_nope, v = kv[..., :QK_NOPE], kv[..., QK_NOPE:]
    k_pe = k_pe.reshape(B, 1, S, QK_ROPE)

    q_pe = apply_rotary(q_pe, cos, sin)
    k_pe = jnp.broadcast_to(apply_rotary(k_pe, cos, sin), (B, NUM_HEADS, S, QK_ROPE))

    qs = jnp.concatenate([q_nope, q_pe], axis=-1)
    ks = jnp.concatenate([k_nope, k_pe], axis=-1)

    causal = jnp.where(jnp.arange(S)[:, None] >= jnp.arange(S)[None, :], 0.0, -1e9)
    s = jnp.einsum("bhqd,bhkd->bhqk", qs, ks) * SCALING + causal[None, None]
    p = jax.nn.softmax(s, axis=-1)
    o = jnp.einsum("bhqk,bhkd->bhqd", p, v)
    o = o.transpose(0, 2, 1, 3).reshape(B * S, NUM_HEADS * V_HEAD)
    return (o @ params["o_proj"].T).reshape(B, S, hid), p


if __name__ == "__main__":
    key = jax.random.PRNGKey(0)
    ks = jax.random.split(key, 8)
    std = 0.02
    params = {
        "q_a_proj": jax.random.normal(ks[0], (Q_LORA, HIDDEN), jnp.float32) * std,
        "q_a_ln": jnp.ones((Q_LORA,), jnp.float32),
        "q_b_proj": jax.random.normal(ks[1], (NUM_HEADS * QK_HEAD, Q_LORA), jnp.float32) * std,
        "kv_a_proj": jax.random.normal(ks[2], (KV_LORA + QK_ROPE, HIDDEN), jnp.float32) * std,
        "kv_a_ln": jnp.ones((KV_LORA,), jnp.float32),
        "kv_b_proj": jax.random.normal(
            ks[3], (NUM_HEADS * (QK_NOPE + V_HEAD), KV_LORA), jnp.float32
        ) * std,
        "o_proj": jax.random.normal(ks[4], (HIDDEN, NUM_HEADS * V_HEAD), jnp.float32) * std,
    }

    hidden_states = jax.random.normal(ks[5], (BATCH, SEQ, HIDDEN), jnp.float32)

    # rotary frequencies (freqs_cis = cos + i*sin), shape (B, S, QK_ROPE // 2)
    inv_freq = 1.0 / (ROPE_THETA ** (jnp.arange(0, QK_ROPE, 2, dtype=jnp.float32) / QK_ROPE))
    pos = jnp.arange(SEQ, dtype=jnp.float32)
    freqs = pos[:, None] * inv_freq[None, :]                     # (S, QK_ROPE//2)
    cos = jnp.broadcast_to(jnp.cos(freqs)[None], (BATCH, SEQ, QK_ROPE // 2))
    sin = jnp.broadcast_to(jnp.sin(freqs)[None], (BATCH, SEQ, QK_ROPE // 2))

    prep = prepare_params(params)
    out, attn_w = deepseek_v2_attention_forward(prep, hidden_states, cos, sin)
    out = jax.block_until_ready(out)
    attn_w = jax.block_until_ready(attn_w)

    ref_out, ref_w = reference_forward(params, hidden_states, cos, sin)
    assert out.shape == (BATCH, SEQ, HIDDEN)
    assert attn_w.shape == (BATCH, NUM_HEADS, SEQ, SEQ)
    assert bool(jnp.all(jnp.isfinite(out)))
    assert bool(jnp.allclose(out, ref_out, atol=2e-2, rtol=2e-2))
    assert bool(jnp.allclose(attn_w, ref_w, atol=2e-2, rtol=2e-2))

    # TODO(synk): KV cache update and attention dropout (training mode) are not modeled;
    # this matches the torch module in eval mode with past_key_value=None.
    print("KERNEL_OK")
</pallas_src>

<mosaic_0001>
module attributes {stable_mosaic.version = 11 : i64} {
  func.func @_mla_fused_kernel(%arg0: i32, %arg1: memref<16x64xbf16, #tpu.memory_space<vmem>>, %arg2: memref<64x32xbf16, #tpu.memory_space<vmem>>, %arg3: memref<1x32xf32, #tpu.memory_space<vmem>>, %arg4: memref<32x96xbf16, #tpu.memory_space<vmem>>, %arg5: memref<64x48xbf16, #tpu.memory_space<vmem>>, %arg6: memref<1x32xf32, #tpu.memory_space<vmem>>, %arg7: memref<32x128xbf16, #tpu.memory_space<vmem>>, %arg8: memref<64x64xbf16, #tpu.memory_space<vmem>>, %arg9: memref<16x32xf32, #tpu.memory_space<vmem>>, %arg10: memref<16x32xf32, #tpu.memory_space<vmem>>, %arg11: memref<16x64xf32, #tpu.memory_space<vmem>>, %arg12: memref<16x32xf32, #tpu.memory_space<vmem>>) attributes {dimension_semantics = [#tpu.dimension_semantics<arbitrary>], iteration_bounds = array<i64: 1>, scalar_prefetch = 0 : i64, scratch_operands = 0 : i64, tpu.core_type = #tpu.core_type<tc>, window_params = [{pipeline_mode = #tpu.pipeline_mode<synchronous>, transform_indices = @transform_0, window_bounds = array<i64: 16, 64>}, {pipeline_mode = #tpu.pipeline_mode<synchronous>, transform_indices = @transform_1, window_bounds = array<i64: 64, 32>}, {pipeline_mode = #tpu.pipeline_mode<synchronous>, transform_indices = @transform_2, window_bounds = array<i64: 1, 32>}, {pipeline_mode = #tpu.pipeline_mode<synchronous>, transform_indices = @transform_3, window_bounds = array<i64: 32, 96>}, {pipeline_mode = #tpu.pipeline_mode<synchronous>, transform_indices = @transform_4, window_bounds = array<i64: 64, 48>}, {pipeline_mode = #tpu.pipeline_mode<synchronous>, transform_indices = @transform_5, window_bounds = array<i64: 1, 32>}, {pipeline_mode = #tpu.pipeline_mode<synchronous>, transform_indices = @transform_6, window_bounds = array<i64: 32, 128>}, {pipeline_mode = #tpu.pipeline_mode<synchronous>, transform_indices = @transform_7, window_bounds = array<i64: 64, 64>}, {pipeline_mode = #tpu.pipeline_mode<synchronous>, transform_indices = @transform_8, window_bounds = array<i64: 16, 32>}, {pipeline_mode = #tpu.pipeline_mode<synchronous>, transform_indices = @transform_9, window_bounds = array<i64: 16, 32>}, {pipeline_mode = #tpu.pipeline_mode<synchronous>, transform_indices = @transform_10, window_bounds = array<i64: 16, 64>}, {pipeline_mode = #tpu.pipeline_mode<synchronous>, transform_indices = @transform_11, window_bounds = array<i64: 16, 32>}]} {
    %c0 = arith.constant 0 : index
    %c0_0 = arith.constant 0 : index
    %0 = vector.load %arg1[%c0, %c0_0] : memref<16x64xbf16, #tpu.memory_space<vmem>>, vector<16x64xbf16>
    %c0_1 = arith.constant 0 : index
    %c0_2 = arith.constant 0 : index
    %1 = vector.load %arg2[%c0_1, %c0_2] : memref<64x32xbf16, #tpu.memory_space<vmem>>, vector<64x32xbf16>
    %cst = arith.constant dense<0.000000e+00> : vector<16x32xf32>
    %2 = tpu.matmul %0, %1, %cst {dimension_numbers = #tpu.dot_dimension_numbers<[1], [0], [0], [1], [0, 0, 1, 1], [], []>} : vector<16x64xbf16>, vector<64x32xbf16>, vector<16x32xf32> -> vector<16x32xf32>
    %c0_3 = arith.constant 0 : index
    %c0_4 = arith.constant 0 : index
    %3 = vector.load %arg3[%c0_3, %c0_4] : memref<1x32xf32, #tpu.memory_space<vmem>>, vector<1x32xf32>
    %4 = arith.mulf %2, %2 : vector<16x32xf32>
    %cst_5 = arith.constant dense<0.000000e+00> : vector<16xf32>
    %5 = vector.multi_reduction <add>, %4, %cst_5 [1] : vector<16x32xf32> to vector<16xf32>
    %6 = vector.shape_cast %5 : vector<16xf32> to vector<16x1xf32>
    %cst_6 = arith.constant 3.200000e+01 : f32
    %7 = vector.broadcast %cst_6 : f32 to vector<16x1xf32>
    %8 = arith.divf %6, %7 : vector<16x1xf32>
    %cst_7 = arith.constant 9.99999997E-7 : f32
    %9 = vector.broadcast %cst_7 : f32 to vector<16x1xf32>
    %10 = arith.addf %8, %9 : vector<16x1xf32>
    %11 = math.rsqrt %10 : vector<16x1xf32>
    %12 = vector.broadcast %11 : vector<16x1xf32> to vector<16x32xf32>
    %13 = arith.mulf %2, %12 : vector<16x32xf32>
    %14 = vector.broadcast %3 : vector<1x32xf32> to vector<16x32xf32>
    %15 = arith.mulf %13, %14 : vector<16x32xf32>
    %16 = arith.truncf %15 : vector<16x32xf32> to vector<16x32xbf16>
    %c0_8 = arith.constant 0 : index
    %c0_9 = arith.constant 0 : index
    %17 = vector.load %arg4[%c0_8, %c0_9] : memref<32x96xbf16, #tpu.memory_space<vmem>>, vector<32x96xbf16>
    %cst_10 = arith.constant dense<0.000000e+00> : vector<16x96xf32>
    %18 = tpu.matmul %16, %17, %cst_10 {dimension_numbers = #tpu.dot_dimension_numbers<[1], [0], [0], [1], [0, 0, 1, 1], [], []>} : vector<16x32xbf16>, vector<32x96xbf16>, vector<16x96xf32> -> vector<16x96xf32>
    %19 = vector.extract_strided_slice %18 {offsets = [0, 0], sizes = [16, 64], strides = [1, 1]} : vector<16x96xf32> to vector<16x64xf32>
    %20 = vector.extract_strided_slice %18 {offsets = [0, 64], sizes = [16, 32], strides = [1, 1]} : vector<16x96xf32> to vector<16x32xf32>
    %c0_11 = arith.constant 0 : index
    %c0_12 = arith.constant 0 : index
    %21 = vector.load %arg5[%c0_11, %c0_12] : memref<64x48xbf16, #tpu.memory_space<vmem>>, vector<64x48xbf16>
    %cst_13 = arith.constant dense<0.000000e+00> : vector<16x48xf32>
    %22 = tpu.matmul %0, %21, %cst_13 {dimension_numbers = #tpu.dot_dimension_numbers<[1], [0], [0], [1], [0, 0, 1, 1], [], []>} : vector<16x64xbf16>, vector<64x48xbf16>, vector<16x48xf32> -> vector<16x48xf32>
    %23 = vector.extract_strided_slice %22 {offsets = [0, 0], sizes = [16, 32], strides = [1, 1]} : vector<16x48xf32> to vector<16x32xf32>
    %c0_14 = arith.constant 0 : index
    %c0_15 = arith.constant 0 : index
    %24 = vector.load %arg6[%c0_14, %c0_15] : memref<1x32xf32, #tpu.memory_space<vmem>>, vector<1x32xf32>
    %25 = arith.mulf %23, %23 : vector<16x32xf32>
    %cst_16 = arith.constant dense<0.000000e+00> : vector<16xf32>
    %26 = vector.multi_reduction <add>, %25, %cst_16 [1] : vector<16x32xf32> to vector<16xf32>
    %27 = vector.shape_cast %26 : vector<16xf32> to vector<16x1xf32>
    %cst_17 = arith.constant 3.200000e+01 : f32
    %28 = vector.broadcast %cst_17 : f32 to vector<16x1xf32>
    %29 = arith.divf %27, %28 : vector<16x1xf32>
    %cst_18 = arith.constant 9.99999997E-7 : f32
    %30 = vector.broadcast %cst_18 : f32 to vector<16x1xf32>
    %31 = arith.addf %29, %30 : vector<16x1xf32>
    %32 = math.rsqrt %31 : vector<16x1xf32>
    %33 = vector.broadcast %32 : vector<16x1xf32> to vector<16x32xf32>
    %34 = arith.mulf %23, %33 : vector<16x32xf32>
    %35 = vector.broadcast %24 : vector<1x32xf32> to vector<16x32xf32>
    %36 = arith.mulf %34, %35 : vector<16x32xf32>
    %37 = arith.truncf %36 : vector<16x32xf32> to vector<16x32xbf16>
    %38 = vector.extract_strided_slice %22 {offsets = [0, 32], sizes = [16, 16], strides = [1, 1]} : vector<16x48xf32> to vector<16x16xf32>
    %c0_19 = arith.constant 0 : index
    %c0_20 = arith.constant 0 : index
    %39 = vector.load %arg7[%c0_19, %c0_20] : memref<32x128xbf16, #tpu.memory_space<vmem>>, vector<32x128xbf16>
    %cst_21 = arith.constant dense<0.000000e+00> : vector<16x128xf32>
    %40 = tpu.matmul %37, %39, %cst_21 {dimension_numbers = #tpu.dot_dimension_numbers<[1], [0], [0], [1], [0, 0, 1, 1], [], []>} : vector<16x32xbf16>, vector<32x128xbf16>, vector<16x128xf32> -> vector<16x128xf32>
    %41 = vector.extract_strided_slice %40 {offsets = [0, 0], sizes = [16, 64], strides = [1, 1]} : vector<16x128xf32> to vector<16x64xf32>
    %42 = vector.extract_strided_slice %40 {offsets = [0, 64], sizes = [16, 64], strides = [1, 1]} : vector<16x128xf32> to vector<16x64xf32>
    %43 = tpu.iota {dimensions = array<i32: 0>} : vector<32x32xi32>
    %44 = tpu.iota {dimensions = array<i32: 1>} : vector<32x32xi32>
    %c1_i32 = arith.constant 1 : i32
    %45 = vector.broadcast %c1_i32 : i32 to vector<32x32xi32>
    %46 = arith.addi %44, %45 : vector<32x32xi32>
    %47 = arith.cmpi eq, %43, %46 : vector<32x32xi32>
    %c2_i32 = arith.constant 2 : i32
    %c0_i32 = arith.constant 0 : i32
    %48 = arith.cmpi eq, %c2_i32, %c0_i32 : i32
    %c1_i32_22 = arith.constant 1 : i32
    %49 = arith.select %48, %c1_i32_22, %c2_i32 : i32
    %50 = vector.broadcast %49 : i32 to vector<32x32xi32>
    %51 = arith.remsi %44, %50 : vector<32x32xi32>
    %c0_i32_23 = arith.constant 0 : i32
    %52 = vector.broadcast %c0_i32_23 : i32 to vector<32x32xi32>
    %53 = arith.cmpi ne, %51, %52 : vector<32x32xi32>
    %c0_i32_24 = arith.constant 0 : i32
    %54 = vector.broadcast %c0_i32_24 : i32 to vector<32x32xi32>
    %55 = arith.cmpi slt, %51, %54 : vector<32x32xi32>
    %c0_i32_25 = arith.constant 0 : i32
    %56 = arith.cmpi slt, %49, %c0_i32_25 : i32
    %57 = vector.broadcast %56 : i1 to vector<32x32xi1>
    %58 = vector.broadcast %57 : vector<32x32xi1> to vector<32x32xi1>
    %59 = arith.xori %55, %58 : vector<32x32xi1>
    %60 = arith.andi %59, %53 : vector<32x32xi1>
    %61 = vector.broadcast %49 : i32 to vector<32x32xi32>
    %62 = arith.addi %51, %61 : vector<32x32xi32>
    %63 = arith.select %60, %62, %51 : vector<32x32xi1>, vector<32x32xi32>
    %c0_i32_26 = arith.constant 0 : i32
    %64 = vector.broadcast %c0_i32_26 : i32 to vector<32x32xi32>
    %65 = arith.cmpi eq, %63, %64 : vector<32x32xi32>
    %66 = arith.andi %47, %65 : vector<32x32xi1>
    %cst_27 = arith.constant -1.000000e+00 : f32
    %cst_28 = arith.constant 0.000000e+00 : f32
    %67 = vector.broadcast %cst_27 : f32 to vector<32x32xf32>
    %68 = vector.broadcast %cst_28 : f32 to vector<32x32xf32>
    %69 = arith.select %66, %67, %68 : vector<32x32xi1>, vector<32x32xf32>
    %c1_i32_29 = arith.constant 1 : i32
    %70 = vector.broadcast %c1_i32_29 : i32 to vector<32x32xi32>
    %71 = arith.addi %43, %70 : vector<32x32xi32>
    %72 = arith.cmpi eq, %44, %71 : vector<32x32xi32>
    %c2_i32_30 = arith.constant 2 : i32
    %c0_i32_31 = arith.constant 0 : i32
    %73 = arith.cmpi eq, %c2_i32_30, %c0_i32_31 : i32
    %c1_i32_32 = arith.constant 1 : i32
    %74 = arith.select %73, %c1_i32_32, %c2_i32_30 : i32
    %75 = vector.broadcast %74 : i32 to vector<32x32xi32>
    %76 = arith.remsi %43, %75 : vector<32x32xi32>
    %c0_i32_33 = arith.constant 0 : i32
    %77 = vector.broadcast %c0_i32_33 : i32 to vector<32x32xi32>
    %78 = arith.cmpi ne, %76, %77 : vector<32x32xi32>
    %c0_i32_34 = arith.constant 0 : i32
    %79 = vector.broadcast %c0_i32_34 : i32 to vector<32x32xi32>
    %80 = arith.cmpi slt, %76, %79 : vector<32x32xi32>
    %c0_i32_35 = arith.constant 0 : i32
    %81 = arith.cmpi slt, %74, %c0_i32_35 : i32
    %82 = vector.broadcast %81 : i1 to vector<32x32xi1>
    %83 = vector.broadcast %82 : vector<32x32xi1> to vector<32x32xi1>
    %84 = arith.xori %80, %83 : vector<32x32xi1>
    %85 = arith.andi %84, %78 : vector<32x32xi1>
    %86 = vector.broadcast %74 : i32 to vector<32x32xi32>
    %87 = arith.addi %76, %86 : vector<32x32xi32>
    %88 = arith.select %85, %87, %76 : vector<32x32xi1>, vector<32x32xi32>
    %c0_i32_36 = arith.constant 0 : i32
    %89 = vector.broadcast %c0_i32_36 : i32 to vector<32x32xi32>
    %90 = arith.cmpi eq, %88, %89 : vector<32x32xi32>
    %91 = arith.andi %72, %90 : vector<32x32xi1>
    %cst_37 = arith.constant 1.000000e+00 : f32
    %cst_38 = arith.constant 0.000000e+00 : f32
    %92 = vector.broadcast %cst_37 : f32 to vector<32x32xf32>
    %93 = vector.broadcast %cst_38 : f32 to vector<32x32xf32>
    %94 = arith.select %91, %92, %93 : vector<32x32xi1>, vector<32x32xf32>
    %95 = arith.addf %69, %94 : vector<32x32xf32>
    %96 = arith.truncf %95 : vector<32x32xf32> to vector<32x32xbf16>
    %c0_39 = arith.constant 0 : index
    %c0_40 = arith.constant 0 : index
    %97 = vector.load %arg9[%c0_39, %c0_40] : memref<16x32xf32, #tpu.memory_space<vmem>>, vector<16x32xf32>
    %c0_41 = arith.constant 0 : index
    %c0_42 = arith.constant 0 : index
    %98 = vector.load %arg10[%c0_41, %c0_42] : memref<16x32xf32, #tpu.memory_space<vmem>>, vector<16x32xf32>
    %99 = arith.mulf %20, %97 : vector<16x32xf32>
    %100 = arith.truncf %20 : vector<16x32xf32> to vector<16x32xbf16>
    %cst_43 = arith.constant dense<0.000000e+00> : vector<16x32xf32>
    %101 = tpu.matmul %100, %96, %cst_43 {dimension_numbers = #tpu.dot_dimension_numbers<[1], [0], [0], [1], [0, 0, 1, 1], [], []>} : vector<16x32xbf16>, vector<32x32xbf16>, vector<16x32xf32> -> vector<16x32xf32>
    %102 = arith.mulf %101, %98 : vector<16x32xf32>
    %103 = arith.addf %99, %102 : vector<16x32xf32>
    %104 = vector.extract_strided_slice %97 {offsets = [0, 0], sizes = [16, 16], strides = [1, 1]} : vector<16x32xf32> to vector<16x16xf32>
    %105 = arith.mulf %38, %104 : vector<16x16xf32>
    %106 = arith.truncf %38 : vector<16x16xf32> to vector<16x16xbf16>
    %107 = vector.extract_strided_slice %96 {offsets = [0, 0], sizes = [16, 16], strides = [1, 1]} : vector<32x32xbf16> to vector<16x16xbf16>
    %cst_44 = arith.constant dense<0.000000e+00> : vector<16x16xf32>
    %108 = tpu.matmul %106, %107, %cst_44 {dimension_numbers = #tpu.dot_dimension_numbers<[1], [0], [0], [1], [0, 0, 1, 1], [], []>} : vector<16x16xbf16>, vector<16x16xbf16>, vector<16x16xf32> -> vector<16x16xf32>
    %109 = vector.extract_strided_slice %98 {offsets = [0, 0], sizes = [16, 16], strides = [1, 1]} : vector<16x32xf32> to vector<16x16xf32>
    %110 = arith.mulf %108, %109 : vector<16x16xf32>
    %111 = arith.addf %105, %110 : vector<16x16xf32>
    %112 = arith.truncf %111 : vector<16x16xf32> to vector<16x16xbf16>
    %113 = tpu.iota {dimensions = array<i32: 0>} : vector<16x16xi32>
    %114 = tpu.iota {dimensions = array<i32: 1>} : vector<16x16xi32>
    %false = arith.constant false
    %115 = vector.broadcast %false : i1 to vector<16x16xi1>
    %c0_i32_45 = arith.constant 0 : i32
    %116 = vector.broadcast %c0_i32_45 : i32 to vector<16x16xi32>
    %117 = arith.cmpi sge, %113, %116 : vector<16x16xi32>
    %c8_i32 = arith.constant 8 : i32
    %118 = vector.broadcast %c8_i32 : i32 to vector<16x16xi32>
    %119 = arith.cmpi slt, %113, %118 : vector<16x16xi32>
    %120 = arith.andi %117, %119 : vector<16x16xi1>
    %c0_i32_46 = arith.constant 0 : i32
    %121 = vector.broadcast %c0_i32_46 : i32 to vector<16x16xi32>
    %122 = arith.cmpi sge, %114, %121 : vector<16x16xi32>
    %c8_i32_47 = arith.constant 8 : i32
    %123 = vector.broadcast %c8_i32_47 : i32 to vector<16x16xi32>
    %124 = arith.cmpi slt, %114, %123 : vector<16x16xi32>
    %125 = arith.andi %122, %124 : vector<16x16xi1>
    %126 = arith.andi %120, %125 : vector<16x16xi1>
    %127 = arith.ori %115, %126 : vector<16x16xi1>
    %c8_i32_48 = arith.constant 8 : i32
    %128 = vector.broadcast %c8_i32_48 : i32 to vector<16x16xi32>
    %129 = arith.cmpi sge, %113, %128 : vector<16x16xi32>
    %c16_i32 = arith.constant 16 : i32
    %130 = vector.broadcast %c16_i32 : i32 to vector<16x16xi32>
    %131 = arith.cmpi slt, %113, %130 : vector<16x16xi32>
    %132 = arith.andi %129, %131 : vector<16x16xi1>
    %c8_i32_49 = arith.constant 8 : i32
    %133 = vector.broadcast %c8_i32_49 : i32 to vector<16x16xi32>
    %134 = arith.cmpi sge, %114, %133 : vector<16x16xi32>
    %c16_i32_50 = arith.constant 16 : i32
    %135 = vector.broadcast %c16_i32_50 : i32 to vector<16x16xi32>
    %136 = arith.cmpi slt, %114, %135 : vector<16x16xi32>
    %137 = arith.andi %134, %136 : vector<16x16xi1>
    %138 = arith.andi %132, %137 : vector<16x16xi1>
    %139 = arith.ori %127, %138 : vector<16x16xi1>
    %140 = arith.cmpi sge, %113, %114 : vector<16x16xi32>
    %141 = arith.andi %139, %140 : vector<16x16xi1>
    %cst_51 = arith.constant 0.000000e+00 : f32
    %cst_52 = arith.constant -1.000000e+09 : f32
    %142 = vector.broadcast %cst_51 : f32 to vector<16x16xf32>
    %143 = vector.broadcast %cst_52 : f32 to vector<16x16xf32>
    %144 = arith.select %141, %142, %143 : vector<16x16xi1>, vector<16x16xf32>
    %c0_53 = arith.constant 0 : index
    %c0_54 = arith.constant 0 : index
    %145 = vector.load %arg8[%c0_53, %c0_54] : memref<64x64xbf16, #tpu.memory_space<vmem>>, vector<64x64xbf16>
    %cst_55 = arith.constant 0.000000e+00 : f32
    %146 = vector.broadcast %cst_55 : f32 to vector<16x64xf32>
    %147 = vector.extract_strided_slice %19 {offsets = [0, 0], sizes = [16, 32], strides = [1, 1]} : vector<16x64xf32> to vector<16x32xf32>
    %148 = arith.truncf %147 : vector<16x32xf32> to vector<16x32xbf16>
    %149 = vector.extract_strided_slice %41 {offsets = [0, 0], sizes = [16, 32], strides = [1, 1]} : vector<16x64xf32> to vector<16x32xf32>
    %150 = arith.truncf %149 : vector<16x32xf32> to vector<16x32xbf16>
    %151 = vector.extract_strided_slice %103 {offsets = [0, 0], sizes = [16, 16], strides = [1, 1]} : vector<16x32xf32> to vector<16x16xf32>
    %152 = arith.truncf %151 : vector<16x16xf32> to vector<16x16xbf16>
    %153 = vector.extract_strided_slice %42 {offsets = [0, 0], sizes = [16, 32], strides = [1, 1]} : vector<16x64xf32> to vector<16x32xf32>
    %154 = arith.truncf %153 : vector<16x32xf32> to vector<16x32xbf16>
    %cst_56 = arith.constant dense<0.000000e+00> : vector<16x16xf32>
    %155 = tpu.matmul %148, %150, %cst_56 {dimension_numbers = #tpu.dot_dimension_numbers<[1], [1], [0], [0], [0, 0, 1, 0], [], []>} : vector<16x32xbf16>, vector<16x32xbf16>, vector<16x16xf32> -> vector<16x16xf32>
    %cst_57 = arith.constant dense<0.000000e+00> : vector<16x16xf32>
    %156 = tpu.matmul %152, %112, %cst_57 {dimension_numbers = #tpu.dot_dimension_numbers<[1], [1], [0], [0], [0, 0, 1, 0], [], []>} : vector<16x16xbf16>, vector<16x16xbf16>, vector<16x16xf32> -> vector<16x16xf32>
    %157 = arith.addf %155, %156 : vector<16x16xf32>
    %158 = arith.addf %157, %144 : vector<16x16xf32>
    %cst_58 = arith.constant dense<0xFF800000> : vector<16xf32>
    %159 = vector.multi_reduction <maximumf>, %158, %cst_58 [1] : vector<16x16xf32> to vector<16xf32>
    %160 = vector.shape_cast %159 : vector<16xf32> to vector<16x1xf32>
    %161 = vector.broadcast %160 : vector<16x1xf32> to vector<16x16xf32>
    %162 = arith.subf %158, %161 : vector<16x16xf32>
    %163 = math.exp %162 : vector<16x16xf32>
    %cst_59 = arith.constant dense<0.000000e+00> : vector<16xf32>
    %164 = vector.multi_reduction <add>, %163, %cst_59 [1] : vector<16x16xf32> to vector<16xf32>
    %165 = vector.shape_cast %164 : vector<16xf32> to vector<16x1xf32>
    %166 = vector.broadcast %165 : vector<16x1xf32> to vector<16x16xf32>
    %167 = arith.divf %163, %166 : vector<16x16xf32>
    %c0_60 = arith.constant 0 : index
    %c0_61 = arith.constant 0 : index
    %168 = vector.load %arg12[%c0_60, %c0_61] : memref<16x32xf32, #tpu.memory_space<vmem>>, vector<16x16xf32>
    tpu.vector_store %arg12[%c0_60, %c0_61], %167 {strides = array<i32>} : memref<16x32xf32, #tpu.memory_space<vmem>>, vector<16x16xf32>,
    %169 = arith.truncf %167 : vector<16x16xf32> to vector<16x16xbf16>
    %cst_62 = arith.constant dense<0.000000e+00> : vector<16x32xf32>
    %170 = tpu.matmul %169, %154, %cst_62 {dimension_numbers = #tpu.dot_dimension_numbers<[1], [0], [0], [1], [0, 0, 1, 1], [], []>} : vector<16x16xbf16>, vector<16x32xbf16>, vector<16x32xf32> -> vector<16x32xf32>
    %171 = arith.truncf %170 : vector<16x32xf32> to vector<16x32xbf16>
    %172 = vector.extract_strided_slice %145 {offsets = [0, 0], sizes = [32, 64], strides = [1, 1]} : vector<64x64xbf16> to vector<32x64xbf16>
    %cst_63 = arith.constant dense<0.000000e+00> : vector<16x64xf32>
    %173 = tpu.matmul %171, %172, %cst_63 {dimension_numbers = #tpu.dot_dimension_numbers<[1], [0], [0], [1], [0, 0, 1, 1], [], []>} : vector<16x32xbf16>, vector<32x64xbf16>, vector<16x64xf32> -> vector<16x64xf32>
    %174 = arith.addf %146, %173 : vector<16x64xf32>
    %175 = vector.extract_strided_slice %19 {offsets = [0, 32], sizes = [16, 32], strides = [1, 1]} : vector<16x64xf32> to vector<16x32xf32>
    %176 = arith.truncf %175 : vector<16x32xf32> to vector<16x32xbf16>
    %177 = vector.extract_strided_slice %41 {offsets = [0, 32], sizes = [16, 32], strides = [1, 1]} : vector<16x64xf32> to vector<16x32xf32>
    %178 = arith.truncf %177 : vector<16x32xf32> to vector<16x32xbf16>
    %179 = vector.extract_strided_slice %103 {offsets = [0, 16], sizes = [16, 16], strides = [1, 1]} : vector<16x32xf32> to vector<16x16xf32>
    %180 = arith.truncf %179 : vector<16x16xf32> to vector<16x16xbf16>
    %181 = vector.extract_strided_slice %42 {offsets = [0, 32], sizes = [16, 32], strides = [1, 1]} : vector<16x64xf32> to vector<16x32xf32>
    %182 = arith.truncf %181 : vector<16x32xf32> to vector<16x32xbf16>
    %cst_64 = arith.constant dense<0.000000e+00> : vector<16x16xf32>
    %183 = tpu.matmul %176, %178, %cst_64 {dimension_numbers = #tpu.dot_dimension_numbers<[1], [1], [0], [0], [0, 0, 1, 0], [], []>} : vector<16x32xbf16>, vector<16x32xbf16>, vector<16x16xf32> -> vector<16x16xf32>
    %cst_65 = arith.constant dense<0.000000e+00> : vector<16x16xf32>
    %184 = tpu.matmul %180, %112, %cst_65 {dimension_numbers = #tpu.dot_dimension_numbers<[1], [1], [0], [0], [0, 0, 1, 0], [], []>} : vector<16x16xbf16>, vector<16x16xbf16>, vector<16x16xf32> -> vector<16x16xf32>
    %185 = arith.addf %183, %184 : vector<16x16xf32>
    %186 = arith.addf %185, %144 : vector<16x16xf32>
    %cst_66 = arith.constant dense<0xFF800000> : vector<16xf32>
    %187 = vector.multi_reduction <maximumf>, %186, %cst_66 [1] : vector<16x16xf32> to vector<16xf32>
    %188 = vector.shape_cast %187 : vector<16xf32> to vector<16x1xf32>
    %189 = vector.broadcast %188 : vector<16x1xf32> to vector<16x16xf32>
    %190 = arith.subf %186, %189 : vector<16x16xf32>
    %191 = math.exp %190 : vector<16x16xf32>
    %cst_67 = arith.constant dense<0.000000e+00> : vector<16xf32>
    %192 = vector.multi_reduction <add>, %191, %cst_67 [1] : vector<16x16xf32> to vector<16xf32>
    %193 = vector.shape_cast %192 : vector<16xf32> to vector<16x1xf32>
    %194 = vector.broadcast %193 : vector<16x1xf32> to vector<16x16xf32>
    %195 = arith.divf %191, %194 : vector<16x16xf32>
    %c0_68 = arith.constant 0 : index
    %c16 = arith.constant 16 : index
    %196 = vector.load %arg12[%c0_68, %c16] : memref<16x32xf32, #tpu.memory_space<vmem>>, vector<16x16xf32>
    tpu.vector_store %arg12[%c0_68, %c16], %195 {strides = array<i32>} : memref<16x32xf32, #tpu.memory_space<vmem>>, vector<16x16xf32>,
    %197 = arith.truncf %195 : vector<16x16xf32> to vector<16x16xbf16>
    %cst_69 = arith.constant dense<0.000000e+00> : vector<16x32xf32>
    %198 = tpu.matmul %197, %182, %cst_69 {dimension_numbers = #tpu.dot_dimension_numbers<[1], [0], [0], [1], [0, 0, 1, 1], [], []>} : vector<16x16xbf16>, vector<16x32xbf16>, vector<16x32xf32> -> vector<16x32xf32>
    %199 = arith.truncf %198 : vector<16x32xf32> to vector<16x32xbf16>
    %200 = vector.extract_strided_slice %145 {offsets = [32, 0], sizes = [32, 64], strides = [1, 1]} : vector<64x64xbf16> to vector<32x64xbf16>
    %cst_70 = arith.constant dense<0.000000e+00> : vector<16x64xf32>
    %201 = tpu.matmul %199, %200, %cst_70 {dimension_numbers = #tpu.dot_dimension_numbers<[1], [0], [0], [1], [0, 0, 1, 1], [], []>} : vector<16x32xbf16>, vector<32x64xbf16>, vector<16x64xf32> -> vector<16x64xf32>
    %202 = arith.addf %174, %201 : vector<16x64xf32>
    %c0_71 = arith.constant 0 : index
    %c0_72 = arith.constant 0 : index
    %203 = vector.load %arg11[%c0_71, %c0_72] : memref<16x64xf32, #tpu.memory_space<vmem>>, vector<16x64xf32>
    tpu.vector_store %arg11[%c0_71, %c0_72], %202 {strides = array<i32>} : memref<16x64xf32, #tpu.memory_space<vmem>>, vector<16x64xf32>,
    return
  }
  func.func @transform_0(%arg0: i32) -> (i32, i32) {
    %c0_i32 = arith.constant 0 : i32
    %c0_i32_0 = arith.constant 0 : i32
    %c0_i32_1 = arith.constant 0 : i32
    return %c0_i32, %c0_i32_0 : i32, i32
  }
  func.func @transform_1(%arg0: i32) -> (i32, i32) {
    %c0_i32 = arith.constant 0 : i32
    %c0_i32_0 = arith.constant 0 : i32
    %c0_i32_1 = arith.constant 0 : i32
    return %c0_i32, %c0_i32_0 : i32, i32
  }
  func.func @transform_2(%arg0: i32) -> (i32, i32) {
    %c0_i32 = arith.constant 0 : i32
    %c0_i32_0 = arith.constant 0 : i32
    %c0_i32_1 = arith.constant 0 : i32
    return %c0_i32, %c0_i32_0 : i32, i32
  }
  func.func @transform_3(%arg0: i32) -> (i32, i32) {
    %c0_i32 = arith.constant 0 : i32
    %c0_i32_0 = arith.constant 0 : i32
    %c0_i32_1 = arith.constant 0 : i32
    return %c0_i32, %c0_i32_0 : i32, i32
  }
  func.func @transform_4(%arg0: i32) -> (i32, i32) {
    %c0_i32 = arith.constant 0 : i32
    %c0_i32_0 = arith.constant 0 : i32
    %c0_i32_1 = arith.constant 0 : i32
    return %c0_i32, %c0_i32_0 : i32, i32
  }
  func.func @transform_5(%arg0: i32) -> (i32, i32) {
    %c0_i32 = arith.constant 0 : i32
    %c0_i32_0 = arith.constant 0 : i32
    %c0_i32_1 = arith.constant 0 : i32
    return %c0_i32, %c0_i32_0 : i32, i32
  }
  func.func @transform_6(%arg0: i32) -> (i32, i32) {
    %c0_i32 = arith.constant 0 : i32
    %c0_i32_0 = arith.constant 0 : i32
    %c0_i32_1 = arith.constant 0 : i32
    return %c0_i32, %c0_i32_0 : i32, i32
  }
  func.func @transform_7(%arg0: i32) -> (i32, i32) {
    %c0_i32 = arith.constant 0 : i32
    %c0_i32_0 = arith.constant 0 : i32
    %c0_i32_1 = arith.constant 0 : i32
    return %c0_i32, %c0_i32_0 : i32, i32
  }
  func.func @transform_8(%arg0: i32) -> (i32, i32) {
    %c0_i32 = arith.constant 0 : i32
    %c0_i32_0 = arith.constant 0 : i32
    %c0_i32_1 = arith.constant 0 : i32
    return %c0_i32, %c0_i32_0 : i32, i32
  }
  func.func @transform_9(%arg0: i32) -> (i32, i32) {
    %c0_i32 = arith.constant 0 : i32
    %c0_i32_0 = arith.constant 0 : i32
    %c0_i32_1 = arith.constant 0 : i32
    return %c0_i32, %c0_i32_0 : i32, i32
  }
  func.func @transform_10(%arg0: i32) -> (i32, i32) {
    %c0_i32 = arith.constant 0 : i32
    %c0_i32_0 = arith.constant 0 : i32
    %c0_i32_1 = arith.constant 0 : i32
    return %c0_i32, %c0_i32_0 : i32, i32
  }
  func.func @transform_11(%arg0: i32) -> (i32, i32) {
    %c0_i32 = arith.constant 0 : i32
    %c0_i32_0 = arith.constant 0 : i32
    %c0_i32_1 = arith.constant 0 : i32
    return %c0_i32, %c0_i32_0 : i32, i32
  }
}

</mosaic_0001>

<bundles_post_ra>
// kernel: tpu_custom_call.1
= control target key start
LH: loop header
LB: loop body
LE: loop exit
PB: predicated region body
PF: predicated region fallthrough
CT: control target
= control target key end

     0   :  { %17 = vsyncpa [#allocation3], 0  ;;  %s1909_s0 = inlined_call_operand.hbm [shape: bf16[16,64], index: 0, kind: input, shape index: {}]   ;;  %s1910_s1 = inlined_call_operand.vmem [shape: bf16[64,32], index: 1, kind: input, shape index: {}]   ;;  %s1911_s2 = inlined_call_operand.hbm [shape: f32[1,32], index: 2, kind: input, shape index: {}]   ;;  %s1912_s3 = inlined_call_operand.vmem [shape: bf16[32,96], index: 3, kind: input, shape index: {}]   ;;  %s1913_s4 = inlined_call_operand.vmem [shape: bf16[64,48], index: 4, kind: input, shape index: {}]   ;;  %s1914_s5 = inlined_call_operand.hbm [shape: f32[1,32], index: 5, kind: input, shape index: {}]   ;;  %s1915_s6 = inlined_call_operand.vmem [shape: bf16[32,128], index: 6, kind: input, shape index: {}]   ;;  %s1916_s7 = inlined_call_operand.vmem [shape: bf16[64,64], index: 7, kind: input, shape index: {}]   ;;  %s1917_s8 = inlined_call_operand.vmem [shape: f32[16,32], index: 8, kind: input, shape index: {}]   ;;  %s1918_s9 = inlined_call_operand.vmem [shape: f32[16,32], index: 9, kind: input, shape index: {}]   ;;  %s1919_s10 = inlined_call_operand.hbm [shape: f32[16,64], index: 10, kind: output, shape index: {0}]   ;;  %s1920_s11 = inlined_call_operand.hbm [shape: f32[16,32], index: 11, kind: output, shape index: {1}]  }
   0x1   :  { %18 = vsyncpa [#allocation6], 0 }
   0x2   :  { %19 = vsyncpa [#allocation4], 0 }
   0x3   :  { %20 = vsyncpa [#allocation10], 0  ;;  %s1547_s17 = smov [#allocation5]   ;;  %s1548_s19 = smov [#allocation2]  }
   0x4   :  { %s41_s18 = sshll.u32 %s1547_s17, 4  ;;  %s26_s20 = sshll.u32 %s1548_s19, 4  ;;  %s42_s18 = int_to_ptr.vmem [resolvable:$true] %s41_s18  ;;  %s27_s20 = int_to_ptr.vmem [resolvable:$true] %s26_s20 }
   0x5   :  { %s1447_s21 = scalar_lea.vmem %s42_s18, 16  ;;  %s1451_s22 = scalar_lea.vmem %s42_s18, 32 }
   0x6   :  { %p1448_p0 = scmp.ne.s32.totalorder %s42_s18, %s1447_s21  ;;  %p1452_p1 = scmp.lt.s32.totalorder %s42_s18, %s42_s18 }
   0x7   :  { %p1453_p2 = scmp.lt.s32.totalorder %s1451_s22, %s1447_s21 }
   0x9   :  { %p1454_p3 = por %p1453_p2, %p1452_p1 }
   0xb   :  { %p1455_p4 = pnand %p1454_p3, %p1448_p0 }
   0xd   :  { %1458 = shalt.err (!%p1455_p4)
}
   0xe   :  { %44 = dma.hbm_to_vmem [thread:$0]  %s1911_s2, 16, %s42_s18, [#allocation6]  }
   0xf   :  { %s1467_s25 = scalar_lea.vmem %s27_s20, 128  ;;  %p1472_p6 = scmp.lt.s32.totalorder %s27_s20, %s27_s20 }
  0x10   :  { %p1468_p5 = scmp.ne.s32.totalorder %s27_s20, %s1467_s25  ;;  %p1473_p7 = scmp.lt.s32.totalorder %s1467_s25, %s1467_s25 }
  0x12   :  { %p1474_p8 = por %p1473_p7, %p1472_p6 }
  0x14   :  { %p1475_p9 = pnand %p1474_p8, %p1468_p5 }
  0x16   :  { %1478 = shalt.err (!%p1475_p9)
}
  0x17   :  { %s1549_s26 = smov 64   ;;  %s1550_s27 = smov 4  }
  0x18   :  { %32 = dma.hbm_to_vmem [thread:$0]  %s1909_s0, 128, %s27_s20, [#allocation3], %s1549_s26, %s1549_s26, %s1550_s27  }
  0x19   :  { %s1551_s30 = smov [#allocation7]  }
  0x1a   :  { %s55_s12 = sshll.u32 %s1551_s30, 4  ;;  %s56_s12 = int_to_ptr.vmem [resolvable:$true] %s55_s12 }
  0x1b   :  { %s1487_s13 = scalar_lea.vmem %s56_s12, 16  ;;  %s1491_s2 = scalar_lea.vmem %s56_s12, 32 }
  0x1c   :  { %p1488_p10 = scmp.ne.s32.totalorder %s56_s12, %s1487_s13  ;;  %p1492_p11 = scmp.lt.s32.totalorder %s56_s12, %s56_s12 }
  0x1d   :  { %p1493_p12 = scmp.lt.s32.totalorder %s1491_s2, %s1487_s13 }
  0x1f   :  { %p1494_p13 = por %p1493_p12, %p1492_p11 }
  0x21   :  { %p1495_p0 = pnand %p1494_p13, %p1488_p10 }
  0x23   :  { %1498 = shalt.err (!%p1495_p0)
}
  0x24   :  { %58 = dma.hbm_to_vmem [thread:$0]  %s1914_s5, 16, %s56_s12, [#allocation6]  }
  0x25   :  { %1539 = dma.done.wait [#allocation3], 128  }
  0x26   :  { %1540 = vsyncadd [#allocation3], 4294967168 }
  0x27   :  { %1541 = dma.done.wait [#allocation6], 32  }
  0x28   :  { %1542 = vsyncadd [#allocation6], 4294967264  ;;  %v1552_v0 = vmov 0.0   ;;  %vm1553_vm0 = vmmov 0   ;;  %v1398_v1 = vld [vmem:[%s1910_s1 + $0x18] sm:$0xff]   ;;  %v1399_v2 = vld [vmem:[%s1910_s1 + $0x10] sm:$0xff]   ;;  %v408_v34 = vlaneseq }
  0x29   :  { %1276 = vmatprep.subr.bf16.mxu0 %v1552_v0  ;;  %1284 = vmatprep.mubr.msk.bf16.mxu0 %vm1553_vm0, %v1552_v0  ;;  %v1400_v3 = vld [vmem:[%s1910_s1 + $0x8] sm:$0xff]   ;;  %v1401_v4 = vld [vmem:[%s1910_s1] sm:$0xff]   ;;  %vm116_vm1 = vcmask 523264   ;;  %vm164_vm2 = vcmask 261120   ;;  %v1405_v29 = vld [vmem:[%s1913_s4 + $0x18] sm:$0xff]   ;;  %s1555_s15 = smov 32  }
  0x2a   :  { %1288 = vmatprep.subr.bf16.mxu1 %v1552_v0  ;;  %1292 = vmatprep.mubr.msk.bf16.mxu1 %vm1553_vm0, %v1552_v0  ;;  %v1402_v5 = vld [vmem:[#allocation2] sm:$0xff]   ;;  %v1403_v14 = vld [vmem:[%s1912_s3 + $0x8] sm:$0xff]   ;;  %v1406_v31 = vld [vmem:[%s1913_s4 + $0x10] sm:$0xff]   ;;  %v1691_v35 = vshrl.u32 %v408_v34, 7  ;;  %v1693_v36 = vand.u32 127, %v408_v34  ;;  %vm601_vm14 = vcmask 130048  }
  0x2b   :  { %1277 = vmatpush3.bf16.msra.mxu0 %v1398_v1  ;;  %1289 = vmatpush3.bf16.msra.mxu1 %v1403_v14  ;;  %v1404_v15 = vld [vmem:[%s1912_s3] sm:$0xff]   ;;  %v1210_v25 = vld [vmem:[#allocation5] ss:$0 sm:$0xff]  ;;  %s1558_s22 = smov 16   ;;  %s1559_s29 = smov [#allocation9]  }
  0x2c   :  { %1278 = vmatprep.subr.bf16.mxu0 %v1552_v0  ;;  %1290 = vmatprep.subr.bf16.mxu1 %v1552_v0  ;;  %v1407_v32 = vld [vmem:[%s1913_s4 + $0x8] sm:$0xff]   ;;  %v1408_v33 = vld [vmem:[%s1913_s4] sm:$0xff]   ;;  %v1696_v37 = vadd.s32 8, %v1691_v35  ;;  %v1699_v38 = vadd.s32 1, %v1693_v36  ;;  %v424_v39 = vand.u32 1, %v1693_v36  ;;  %v441_v40 = vadd.s32 1, %v1691_v35 }
  0x2d   :  { %v453_v41 = vand.u32 1, %v1691_v35  ;;  %s1554_s4 = smov 96   ;;  %v412_v14 = vadd.s32 24, %v1691_v35  ;;  %s1187_s30 = sshll.u32 %s1559_s29, 4  ;;  %s1188_s30 = int_to_ptr.vmem [resolvable:$true] %s1187_s30 }
  0x2e   :  { %vm416_vm3 = vcmp.eq.s32.totalorder %v1691_v35, %v1699_v38  ;;  %vm417_vm4 = vcmp.eq.s32.totalorder %v1696_v37, %v1699_v38  ;;  %vm1708_vm5 = vcmp.eq.s32.totalorder %v424_v39, 0  ;;  %v442_v43 = vadd.s32 1, %v1696_v37  ;;  %v517_v39 = vld [vmem:[%s1918_s9] sm:$0xff]  ;;  %p1504_p2 = scmp.lt.s32.totalorder %s1188_s30, %s1188_s30 }
  0x2f   :  { %1279 = vmatpush3.bf16.msra.mxu0 %v1399_v2  ;;  %1291 = vmatpush3.bf16.msra.mxu1 %v1404_v15  ;;  %vm433_vm6 = vmand %vm416_vm3, %vm1708_vm5  ;;  %vm445_vm7 = vcmp.eq.s32.totalorder %v1693_v36, %v441_v40  ;;  %v460_v44 = vand.u32 1, %v1696_v37  ;;  %vm497_vm8 = vcmp.eq.s32.totalorder %v453_v41, 0  ;;  %vm419_vm3 = vcmp.eq.s32.totalorder %v412_v14, %v1699_v38 }
  0x30   :  { %1280 = vmatprep.subr.bf16.mxu0 %v1552_v0  ;;  %1296 = vmatprep.subr.bf16.mxu1 %v1552_v0  ;;  %vm434_vm9 = vmand %vm417_vm4, %vm1708_vm5  ;;  %v437_v45 = vsel %vm433_vm6, -1.0, %v1552_v0  ;;  %vm446_vm10 = vcmp.eq.s32.totalorder %v1693_v36, %v442_v43  ;;  %v518_v43 = vld [vmem:[%s1918_s9 + $0x8] sm:$0xff]  ;;  %s1557_s9 = smov 48  }
  0x31   :  { %v438_v46 = vsel %vm434_vm9, -1.0, %v1552_v0  ;;  %vm498_vm11 = vcmp.eq.s32.totalorder %v460_v44, 0  ;;  %vm501_vm12 = vmand %vm445_vm7, %vm497_vm8 }
  0x32   :  { %vm502_vm13 = vmand %vm446_vm10, %vm498_vm11  ;;  %v505_v47 = vsel %vm501_vm12, 1.0, %v1552_v0 }
  0x33   :  { %1281 = vmatpush3.bf16.msra.mxu0 %v1400_v3  ;;  %v506_v48 = vsel %vm502_vm13, 1.0, %v1552_v0  ;;  %v509_v49 = vadd.f32 %v505_v47, %v437_v45  ;;  %v1754_v3 = vld [vmem:[%s1917_s8] sm:$0xff]  ;;  %vm436_vm10 = vmand %vm419_vm3, %vm1708_vm5  ;;  %vm683_vm13 = vcmp.ge.s32.totalorder %v1691_v35, %v1693_v36  ;;  %vm677_vm3 = vcmp.lt.s32.totalorder %v1693_v36, 16 }
  0x34   :  { %1282 = vmatprep.subr.bf16.mxu0 %v1552_v0  ;;  %v510_v50 = vadd.f32 %v506_v48, %v438_v46 }
  0x36   :  { %v1724_v51 = vpack.c.bf16 %v510_v50, %v509_v49 }
  0x37   :  { %1283 = vmatpush3.bf16.msra.mxu0 %v1401_v4  ;;  %v1761_v4 = vld [vmem:[%s1917_s8 + $0x8] sm:$0xff] }
  0x38   :  { %1308 = vmatprep.subr.bf16.mxu0 %v1552_v0 }
  0x3a   :  { %1285 = vmatmul.mubr.msk.bf16.vlgmr.msra.gmra.mxu0 %vm116_vm1, %v1402_v5 }
  0x3b   :  { %1312 = vmatprep.mubr.msk.bf16.mxu0 %vm1553_vm0, %v1552_v0 }
  0xfa   :  { %v154_v6 = vpop.f32.mrf.mxu0 }
  0xfb   :  { %v162_v7 = vmul.f32 %v154_v6, %v154_v6 }
  0xfc   :  { %v1286_v8 = vpop.f32.mrf.mxu0 }
  0xfd   :  { %v165_v9 = vsel %vm164_vm2, %v162_v7, 0.0 }
  0xfe   :  { %166 = vadd.xlane.f32.xlu0 %v165_v9  ;;  %v157_v10 = vpop.f32.mrf.mxu0 }
  0xff   :  { %v163_v11 = vmul.f32 %v157_v10, %v157_v10 }
 0x100   :  { %v1287_v12 = vpop.f32.mrf.mxu0 }
 0x101   :  { %v168_v13 = vsel %vm164_vm2, %v163_v11, 0.0  ;;  %v411_v12 = vadd.s32 16, %v1691_v35 }
 0x102   :  { %169 = vadd.xlane.f32.xlu0 %v168_v13 }
 0x103   :  { %vm418_vm15 = vcmp.eq.s32.totalorder %v411_v12, %v1699_v38 }
 0x104   :  { %vm435_vm7 = vmand %vm418_vm15, %vm1708_vm5  ;;  %vm666_vm5 = vcmp.lt.s32.totalorder %v1693_v36, 8  ;;  %vm676_vm15 = vcmp.ge.s32.totalorder %v1693_v36, 8 }
 0x187   :  { %v167_v16 = vpop.xlane.xlu0 %166 }
 0x188   :  { %v172_v17 = vmul.f32 0.03125, %v167_v16  ;;  %v443_v16 = vadd.s32 1, %v411_v12 }
 0x18a   :  { %v174_v18 = vadd.f32 1e-06, %v172_v17  ;;  %v467_v17 = vand.u32 1, %v411_v12  ;;  %vm447_vm4 = vcmp.eq.s32.totalorder %v1693_v36, %v443_v16 }
 0x18b   :  { %v170_v19 = vpop.xlane.xlu0 %169 }
 0x18c   :  { %1415 = vrsqrt.f32 %v174_v18  ;;  %v173_v20 = vmul.f32 0.03125, %v170_v19  ;;  %v444_v18 = vadd.s32 1, %v412_v14  ;;  %v474_v19 = vand.u32 1, %v412_v14 }
 0x18d   :  { %vm499_vm6 = vcmp.eq.s32.totalorder %v467_v17, 0 }
 0x18e   :  { %v175_v21 = vadd.f32 1e-06, %v173_v20  ;;  %vm448_vm8 = vcmp.eq.s32.totalorder %v1693_v36, %v444_v18  ;;  %vm500_vm9 = vcmp.eq.s32.totalorder %v474_v19, 0  ;;  %vm503_vm11 = vmand %vm447_vm4, %vm499_vm6 }
 0x18f   :  { %vm504_vm12 = vmand %vm448_vm8, %vm500_vm9  ;;  %vm1004_vm9 = vcmask 261248  }
 0x190   :  { %1417 = vrsqrt.f32 %v175_v21  ;;  %v439_v21 = vsel %vm435_vm7, -1.0, %v1552_v0  ;;  %vm685_vm4 = vmand %vm666_vm5, %vm683_vm13  ;;  %vm684_vm7 = vcmp.ge.s32.totalorder %v1696_v37, %v1693_v36 }
 0x191   :  { %vm678_vm6 = vmand %vm676_vm15, %vm677_vm3 }
 0x192   :  { %vm686_vm8 = vmand %vm678_vm6, %vm684_vm7 }
 0x199   :  { %v1416_v22 = vpop.eup %1415 }
 0x19a   :  { %v178_v23 = vmul.f32 %v1416_v22, %v154_v6  ;;  %v1410_v6 = vld [vmem:[%s1915_s6] sm:$0xff]   ;;  %v440_v22 = vsel %vm436_vm10, -1.0, %v1552_v0 }
 0x19c   :  { %v186_v27 = vmul.f32 %v1210_v25, %v178_v23  ;;  %v507_v23 = vsel %vm503_vm11, 1.0, %v1552_v0 }
 0x19d   :  { %v1418_v24 = vpop.eup %1417 }
 0x19e   :  { %v179_v26 = vmul.f32 %v1418_v24, %v157_v10  ;;  %v508_v24 = vsel %vm504_vm12, 1.0, %v1552_v0 }
 0x1a0   :  { %v187_v28 = vmul.f32 %v1210_v25, %v179_v26 }
 0x1a2   :  { %v188_v30 = vpack.c.bf16 %v187_v28, %v186_v27  ;;  %v1219_v27 = vld [vmem:[#allocation7] ss:$0 sm:$0xff]  ;;  %v511_v28 = vadd.f32 %v507_v23, %v439_v21  ;;  %v1556_v23 = vmov -1e+09  }
 0x1a3   :  { %v1846_v35 = vsel %vm686_vm8, 0.0, %v1556_v23 }
 0x1a4   :  { %1293 = vmatmul.mubr.msk.bf16.vlgmr.msra.gmra.mxu1 %vm164_vm2, %v188_v30 }
 0x1a5   :  { %1297 = vmatpush3.bf16.msra.mxu1 %v1405_v29  ;;  %1304 = vmatprep.mubr.msk.bf16.mxu1 %vm1553_vm0, %v1552_v0  ;;  %v512_v29 = vadd.f32 %v508_v24, %v440_v22  ;;  %v1843_v24 = vsel %vm685_vm4, 0.0, %v1556_v23 }
 0x1a6   :  { %1298 = vmatprep.subr.bf16.mxu1 %v1552_v0 }
 0x1a9   :  { %1299 = vmatpush3.bf16.msra.mxu1 %v1406_v31 }
 0x1aa   :  { %1300 = vmatprep.subr.bf16.mxu1 %v1552_v0 }
 0x1ad   :  { %1301 = vmatpush3.bf16.msra.mxu1 %v1407_v32 }
 0x1ae   :  { %1302 = vmatprep.subr.bf16.mxu1 %v1552_v0 }
 0x1b1   :  { %1303 = vmatpush3.bf16.msra.mxu1 %v1408_v33  ;;  %v514_v33 = vpack.c.bf16 %v512_v29, %v511_v28 }
 0x1b2   :  { %1324 = vmatprep.subr.bf16.mxu1 %v1552_v0 }
 0x1b4   :  { %1305 = vmatmul.mubr.msk.bf16.vlgmr.msra.gmra.mxu1 %vm116_vm1, %v1402_v5  ;;  %v1409_v5 = vld [vmem:[%s1915_s6 + $0x8] sm:$0xff]  }
 0x1b5   :  { %1326 = vmatprep.mubr.msk.bf16.mxu1 %vm1553_vm0, %v1552_v0  ;;  %1325 = vmatpush3.bf16.msra.mxu1 %v1724_v51 }
 0x1b6   :  { %1336 = vmatprep.subr.bf16.mxu1 %v1552_v0  ;;  %1309 = vmatpush3.bf16.msra.mxu0 %v1409_v5 }
 0x1b7   :  { %1310 = vmatprep.subr.bf16.mxu0 %v1552_v0 }
 0x1ba   :  { %1311 = vmatpush3.bf16.msra.mxu0 %v1410_v6 }
 0x1bb   :  { %1316 = vmatprep.subr.bf16.mxu0 %v1552_v0 }
 0x264   :  { %v1728_v52 = vpop.f32.mrf.mxu1 }
 0x266   :  { %v1294_v53 = vpop.f32.mrf.mxu1 }
 0x268   :  { %v1730_v54 = vpop.f32.mrf.mxu1 }
 0x269   :  { %v1747_v2 = vpack.c.bf16 %v1730_v54, %v1728_v52 }
 0x26a   :  { %v1295_v55 = vpop.f32.mrf.mxu1 }
 0x274   :  { %v1732_v56 = vpop.f32.mrf.mxu1 }
 0x275   :  { %v323_v57 = vmul.f32 %v1732_v56, %v1732_v56 }
 0x276   :  { %v1306_v58 = vpop.f32.mrf.mxu1 }
 0x277   :  { %v325_v59 = vsel %vm164_vm2, %v323_v57, 0.0 }
 0x278   :  { %326 = vadd.xlane.f32.xlu1 %v325_v59  ;;  %v1737_v60 = vpop.f32.mrf.mxu1 }
 0x279   :  { %v597_v61 = vpack.c.bf16 %v1737_v60, %v1732_v56  ;;  %v324_v62 = vmul.f32 %v1737_v60, %v1737_v60 }
 0x27a   :  { %v1307_v63 = vpop.f32.mrf.mxu1 }
 0x27b   :  { %599 = vrot.lane.b32.xlu0 %v597_v61, %s1554_s4  ;;  %v328_v1 = vsel %vm164_vm2, %v324_v62, 0.0 }
 0x27c   :  { %329 = vadd.xlane.f32.xlu1 %v328_v1 }
 0x28d   :  { %531 = vrot.lane.b32.xlu1 %v1747_v2, %s1549_s26 }
 0x291   :  { %589 = vrot.lane.b32.xlu1 %v1754_v3, %s1555_s15 }
 0x295   :  { %591 = vrot.lane.b32.xlu1 %v1761_v4, %s1555_s15 }
 0x2ed   :  { %v600_v7 = vpop.permute.xlu0 %599 }
 0x2ee   :  { %1327 = vmatmul.mubr.msk.bf16.vlgmr.msra.gmra.mxu1 %vm601_vm14, %v600_v7 }
 0x2ef   :  { %1338 = vmatprep.mubr.msk.bf16.mxu1 %vm1553_vm0, %v1552_v0 }
 0x301   :  { %v327_v8 = vpop.xlane.xlu1 %326 }
 0x302   :  { %v331_v9 = vmul.f32 0.03125, %v327_v8 }
 0x304   :  { %v333_v10 = vadd.f32 1e-06, %v331_v9 }
 0x305   :  { %v330_v11 = vpop.xlane.xlu1 %329 }
 0x306   :  { %1419 = vrsqrt.f32 %v333_v10  ;;  %v332_v13 = vmul.f32 0.03125, %v330_v11 }
 0x308   :  { %v334_v15 = vadd.f32 1e-06, %v332_v13 }
 0x309   :  { %v532_v38 = vpop.permute.xlu1 %531 }
 0x30a   :  { %1421 = vrsqrt.f32 %v334_v15 }
 0x30d   :  { %v590_v63 = vpop.permute.xlu1 %589 }
 0x311   :  { %v592_v1 = vpop.permute.xlu1 %591 }
 0x312   :  { %v596_v5 = vmul.f32 %v592_v1, %v1737_v60 }
 0x313   :  { %v1420_v20 = vpop.eup %1419 }
 0x314   :  { %v337_v25 = vmul.f32 %v1420_v20, %v1732_v56 }
 0x316   :  { %v345_v31 = vmul.f32 %v1219_v27, %v337_v25 }
 0x317   :  { %v1422_v26 = vpop.eup %1421 }
 0x318   :  { %v338_v30 = vmul.f32 %v1422_v26, %v1737_v60 }
 0x31a   :  { %v346_v32 = vmul.f32 %v1219_v27, %v338_v30 }
 0x31c   :  { %v347_v34 = vpack.c.bf16 %v346_v32, %v345_v31 }
 0x31e   :  { %1313 = vmatmul.mubr.msk.bf16.vlgmr.msra.gmra.mxu0 %vm164_vm2, %v347_v34 }
 0x31f   :  { %1317 = vmatpush3.bf16.msra.mxu0 %v514_v33  ;;  %1320 = vmatprep.mubr.msk.bf16.mxu0 %vm1553_vm0, %v1552_v0 }
 0x320   :  { %1318 = vmatprep.subr.bf16.mxu0 %v1552_v0 }
 0x323   :  { %1319 = vmatpush3.bf16.msra.mxu0 %v1724_v51 }
 0x324   :  { %1330 = vmatprep.subr.bf16.mxu0 %v1552_v0 }
 0x326   :  { %1321 = vmatmul.mubr.msk.bf16.vlgmr.msra.gmra.mxu0 %vm164_vm2, %v532_v38 }
 0x327   :  { %1332 = vmatprep.mubr.msk.bf16.mxu0 %vm1553_vm0, %v1552_v0 }
 0x3ae   :  { %v639_v40 = vpop.f32.mrf.mxu1 }
 0x3af   :  { %v646_v41 = vmul.f32 %v639_v40, %v517_v39 }
 0x3b0   :  { %v1328_v42 = vpop.f32.mrf.mxu1 }
 0x3b1   :  { %650 = vrot.lane.b32.xlu0 %v646_v41, %s1555_s15 }
 0x3b2   :  { %v642_v44 = vpop.f32.mrf.mxu1 }
 0x3b3   :  { %v647_v45 = vmul.f32 %v642_v44, %v518_v43 }
 0x3b4   :  { %v1329_v46 = vpop.f32.mrf.mxu1 }
 0x3b5   :  { %521 = vrot.lane.b32.xlu0 %v1754_v3, %s1549_s26  ;;  %652 = vrot.lane.b32.xlu1 %v647_v45, %s1555_s15 }
 0x3b9   :  { %523 = vrot.lane.b32.xlu1 %v1761_v4, %s1549_s26  ;;  %v595_v4 = vmul.f32 %v590_v63, %v1732_v56 }
 0x3de   :  { %v401_v47 = vpop.f32.mrf.mxu0 }
 0x3e0   :  { %v1314_v48 = vpop.f32.mrf.mxu0 }
 0x3e2   :  { %v404_v49 = vpop.f32.mrf.mxu0 }
 0x3e3   :  { %v1813_v50 = vpack.c.bf16 %v404_v49, %v401_v47 }
 0x3e4   :  { %v1315_v51 = vpop.f32.mrf.mxu0 }
 0x3e5   :  { %v756_v53 = vsel %vm164_vm2, %v1813_v50, 0 }
 0x3e6   :  { %v570_v55 = vpop.f32.mrf.mxu0  ;;  %1337 = vmatpush3.bf16.xpose.msra.mxu1 %v756_v53 }
 0x3e7   :  { %v577_v57 = vmul.f32 %v570_v55, %v517_v39  ;;  %1348 = vmatprep.subr.bf16.mxu1 %v1552_v0 }
 0x3e8   :  { %v1322_v58 = vpop.f32.mrf.mxu0 }
 0x3e9   :  { %581 = vrot.lane.b32.xlu0 %v577_v57, %s1549_s26 }
 0x3ea   :  { %v573_v59 = vpop.f32.mrf.mxu0 }
 0x3eb   :  { %v578_v61 = vmul.f32 %v573_v59, %v518_v43 }
 0x3ec   :  { %v1323_v62 = vpop.f32.mrf.mxu0 }
 0x3ed   :  { %1339 = vmatmul.mubr.msk.bf16.vlgmr.msra.gmra.mxu1 %vm164_vm2, %v1747_v2  ;;  %583 = vrot.lane.b32.xlu1 %v578_v61, %s1549_s26 }
 0x3ee   :  { %1350 = vmatprep.mubr.msk.bf16.mxu1 %vm1553_vm0, %v1552_v0 }
 0x423   :  { %v651_v3 = vpop.permute.xlu0 %650 }
 0x424   :  { %v656_v7 = vadd.f32 %v651_v3, %v595_v4 }
 0x427   :  { %v653_v6 = vpop.permute.xlu1 %652  ;;  %v522_v10 = vpop.permute.xlu0 %521 }
 0x428   :  { %v657_v8 = vadd.f32 %v653_v6, %v596_v5  ;;  %v527_v13 = vmul.f32 %v522_v10, %v1728_v52 }
 0x42a   :  { %v658_v9 = vpack.c.bf16 %v657_v8, %v656_v7 }
 0x42b   :  { %v524_v11 = vpop.permute.xlu1 %523 }
 0x42c   :  { %703 = vrot.lane.b32.xlu0 %v658_v9, %s1554_s4  ;;  %v528_v14 = vmul.f32 %v524_v11, %v1730_v54 }
 0x45b   :  { %v582_v12 = vpop.permute.xlu0 %581 }
 0x45c   :  { %v587_v16 = vadd.f32 %v582_v12, %v527_v13 }
 0x45f   :  { %v584_v15 = vpop.permute.xlu1 %583 }
 0x460   :  { %v588_v17 = vadd.f32 %v584_v15, %v528_v14 }
 0x462   :  { %v698_v18 = vpack.c.bf16 %v588_v17, %v587_v16 }
 0x464   :  { %700 = vrot.lane.b32.xlu1 %v698_v18, %s1549_s26 }
 0x49e   :  { %v704_v56 = vpop.permute.xlu0 %703 }
 0x49f   :  { %v709_v60 = vsel %vm601_vm14, %v704_v56, 0 }
 0x4a0   :  { %1331 = vmatpush3.bf16.xpose.msra.mxu0 %v709_v60  ;;  %1349 = vmatpush3.bf16.xpose.msra.mxu1 %v709_v60 }
 0x4a1   :  { %1342 = vmatprep.subr.bf16.mxu0 %v1552_v0  ;;  %1360 = vmatprep.subr.bf16.mxu1 %v1552_v0 }
 0x4ad   :  { %v792_v19 = vpop.f32.mrf.mxu1 }
 0x4af   :  { %v1340_v20 = vpop.f32.mrf.mxu1 }
 0x4b1   :  { %v795_v52 = vpop.f32.mrf.mxu1 }
 0x4b3   :  { %v1341_v21 = vpop.f32.mrf.mxu1 }
 0x4d6   :  { %v701_v54 = vpop.permute.xlu1 %700 }
 0x4d7   :  { %1333 = vmatmul.mubr.msk.bf16.vlgmr.msra.gmra.mxu0 %vm601_vm14, %v701_v54 }
 0x4d8   :  { %1344 = vmatprep.mubr.msk.bf16.mxu0 %vm1553_vm0, %v1552_v0 }
 0x597   :  { %v745_v22 = vpop.f32.mrf.mxu0 }
 0x598   :  { %v793_v25 = vadd.f32 %v792_v19, %v745_v22 }
 0x599   :  { %v1334_v26 = vpop.f32.mrf.mxu0 }
 0x59a   :  { %v799_v27 = vadd.f32 %v793_v25, %v1843_v24 }
 0x59b   :  { %v748_v28 = vpop.f32.mrf.mxu0 }
 0x59c   :  { %v796_v29 = vadd.f32 %v795_v52, %v748_v28  ;;  %v801_v30 = vsel %vm601_vm14, %v799_v27, -inf }
 0x59d   :  { %802 = vmax.xlane.f32.xlu0 %v801_v30  ;;  %v1335_v31 = vpop.f32.mrf.mxu0  ;;  %v1411_v30 = vld [vmem:[%s1916_s7 + $0x8] sm:$0xff]  }
 0x59e   :  { %v800_v32 = vadd.f32 %v796_v29, %v1846_v35 }
 0x5a0   :  { %v804_v36 = vsel %vm601_vm14, %v800_v32, -inf }
 0x5a1   :  { %805 = vmax.xlane.f32.xlu1 %v804_v36  ;;  %v1414_v36 = vld [vmem:[%s1916_s7 + $0x10] sm:$0xff]  }
 0x5b2   :  { %923 = vrot.lane.b32.xlu1 %v1813_v50, %s1554_s4 }
 0x5b6   :  { %875 = vrot.lane.b32.xlu1 %v698_v18, %s1557_s9 }
 0x5ba   :  { %921 = vrot.lane.b32.xlu1 %v1747_v2, %s1554_s4 }
 0x626   :  { %v803_v37 = vpop.xlane.xlu0 %802 }
 0x627   :  { %v807_v33 = vsub.f32 %v799_v27, %v803_v37  ;;  %v1413_v27 = vld [vmem:[%s1916_s7 + $0x18] sm:$0xff]  }
 0x629   :  { %v809_v34 = vmul.f32 1.442695, %v807_v33 }
 0x62a   :  { %v806_v38 = vpop.xlane.xlu1 %805 }
 0x62b   :  { %1423 = vpow2.f32 %v809_v34  ;;  %v808_v39 = vsub.f32 %v800_v32, %v806_v38  ;;  %v1412_v32 = vld [vmem:[%s1916_s7] sm:$0xff]   ;;  %s1499_s7 = scalar_lea.vmem %s1188_s30, 256 }
 0x62c   :  { %p1500_p1 = scmp.ne.s32.totalorder %s1188_s30, %s1499_s7  ;;  %p1505_p3 = scmp.lt.s32.totalorder %s1499_s7, %s1499_s7 }
 0x62d   :  { %v811_v40 = vmul.f32 1.442695, %v808_v39 }
 0x62e   :  { %v924_v41 = vpop.permute.xlu1 %923  ;;  %p1506_p4 = por %p1505_p3, %p1504_p2 }
 0x62f   :  { %1425 = vpow2.f32 %v811_v40  ;;  %v929_v58 = vsel %vm164_vm2, %v924_v41, 0 }
 0x630   :  { %p1507_p5 = pnand %p1506_p4, %p1500_p1 }
 0x632   :  { %v876_v42 = vpop.permute.xlu1 %875 }
 0x633   :  { %1351 = vmatmul.mubr.msk.bf16.vlgmr.msra.gmra.mxu1 %vm601_vm14, %v876_v42 }
 0x634   :  { %1362 = vmatprep.mubr.msk.bf16.mxu1 %vm1553_vm0, %v1552_v0 }
 0x636   :  { %v922_v59 = vpop.permute.xlu1 %921 }
 0x638   :  { %v1424_v43 = vpop.eup %1423 }
 0x639   :  { %v813_v44 = vsel %vm601_vm14, %v1424_v43, 0.0 }
 0x63a   :  { %814 = vadd.xlane.f32.xlu0 %v813_v44 }
 0x63c   :  { %v1426_v2 = vpop.eup %1425 }
 0x63d   :  { %v816_v45 = vsel %vm601_vm14, %v1426_v2, 0.0 }
 0x63e   :  { %817 = vadd.xlane.f32.xlu0 %v816_v45 }
 0x654   :  { %827 = vrot.lane.b32.xlu0 %v1813_v50, %s1549_s26 }
 0x6c3   :  { %v815_v46 = vpop.xlane.xlu0 %814 }
 0x6c4   :  { %1427 = vrcp.f32 %v815_v46 }
 0x6c7   :  { %v818_v47 = vpop.xlane.xlu0 %817 }
 0x6c8   :  { %1429 = vrcp.f32 %v818_v47 }
 0x6cb   :  { %v828_v48 = vpop.permute.xlu0 %827 }
 0x6cc   :  { %1343 = vmatpush3.bf16.msra.mxu0 %v828_v48 }
 0x6cd   :  { %1354 = vmatprep.subr.bf16.mxu0 %v1552_v0 }
 0x6d1   :  { %v1428_v49 = vpop.eup %1427 }
 0x6d2   :  { %v820_v51 = vmul.f32 %v1428_v49, %v1424_v43 }
 0x6d4   :  { %823 = vst.msk [vmem:[#allocation9] sm:$0xff] %vm601_vm14, %v820_v51 }
 0x6d5   :  { %v1430_v53 = vpop.eup %1429 }
 0x6d6   :  { %v822_v55 = vmul.f32 %v1430_v53, %v1426_v2 }
 0x6d8   :  { %v825_v57 = vpack.c.bf16 %v822_v55, %v820_v51  ;;  %824 = vst.msk [vmem:[#allocation9 + $0x8] sm:$0xff] %vm601_vm14, %v822_v55 }
 0x6da   :  { %1345 = vmatmul.mubr.msk.bf16.vlgmr.msra.gmra.mxu0 %vm601_vm14, %v825_v57 }
 0x6db   :  { %1355 = vmatpush3.bf16.xpose.msra.mxu0 %v929_v58  ;;  %1356 = vmatprep.mubr.msk.bf16.mxu0 %vm1553_vm0, %v1552_v0 }
 0x6dc   :  { %1366 = vmatprep.subr.bf16.mxu0 %v1552_v0 }
 0x6e2   :  { %1357 = vmatmul.mubr.msk.bf16.vlgmr.msra.gmra.mxu0 %vm164_vm2, %v922_v59 }
 0x6e3   :  { %1370 = vmatprep.mubr.msk.bf16.mxu0 %vm1553_vm0, %v1552_v0  ;;  %1367 = vmatpush3.bf16.msra.mxu0 %v1413_v27 }
 0x6e4   :  { %1368 = vmatprep.subr.bf16.mxu0 %v1552_v0 }
 0x6e7   :  { %1369 = vmatpush3.bf16.msra.mxu0 %v1414_v36 }
 0x6f3   :  { %v914_v61 = vpop.f32.mrf.mxu1 }
 0x6f5   :  { %v1352_v62 = vpop.f32.mrf.mxu1 }
 0x6f7   :  { %v917_v63 = vpop.f32.mrf.mxu1 }
 0x6f9   :  { %v1353_v1 = vpop.f32.mrf.mxu1 }
 0x79a   :  { %v867_v3 = vpop.f32.mrf.mxu0 }
 0x79c   :  { %v1346_v4 = vpop.f32.mrf.mxu0 }
 0x79e   :  { %v870_v5 = vpop.f32.mrf.mxu0 }
 0x79f   :  { %v874_v6 = vpack.c.bf16 %v870_v5, %v867_v3 }
 0x7a0   :  { %v1347_v7 = vpop.f32.mrf.mxu0 }
 0x7a2   :  { %v965_v8 = vpop.f32.mrf.mxu0 }
 0x7a3   :  { %v966_v9 = vadd.f32 %v965_v8, %v914_v61 }
 0x7a4   :  { %v1358_v10 = vpop.f32.mrf.mxu0 }
 0x7a5   :  { %v972_v11 = vadd.f32 %v966_v9, %v1843_v24 }
 0x7a6   :  { %v968_v12 = vpop.f32.mrf.mxu0 }
 0x7a7   :  { %v969_v13 = vadd.f32 %v968_v12, %v917_v63  ;;  %v974_v14 = vsel %vm601_vm14, %v972_v11, -inf }
 0x7a8   :  { %975 = vmax.xlane.f32.xlu0 %v974_v14  ;;  %v1359_v15 = vpop.f32.mrf.mxu0 }
 0x7a9   :  { %v973_v16 = vadd.f32 %v969_v13, %v1846_v35 }
 0x7ab   :  { %v977_v17 = vsel %vm601_vm14, %v973_v16, -inf }
 0x7ac   :  { %978 = vmax.xlane.f32.xlu1 %v977_v17 }
 0x831   :  { %v976_v18 = vpop.xlane.xlu0 %975 }
 0x832   :  { %v980_v56 = vsub.f32 %v972_v11, %v976_v18 }
 0x834   :  { %v982_v60 = vmul.f32 1.442695, %v980_v56 }
 0x835   :  { %v979_v19 = vpop.xlane.xlu1 %978 }
 0x836   :  { %1431 = vpow2.f32 %v982_v60  ;;  %v981_v20 = vsub.f32 %v973_v16, %v979_v19 }
 0x838   :  { %v984_v52 = vmul.f32 1.442695, %v981_v20 }
 0x83a   :  { %1433 = vpow2.f32 %v984_v52 }
 0x843   :  { %v1432_v21 = vpop.eup %1431 }
 0x844   :  { %v986_v54 = vsel %vm601_vm14, %v1432_v21, 0.0 }
 0x845   :  { %987 = vadd.xlane.f32.xlu0 %v986_v54 }
 0x847   :  { %v1434_v22 = vpop.eup %1433 }
 0x848   :  { %v989_v23 = vsel %vm601_vm14, %v1434_v22, 0.0 }
 0x849   :  { %990 = vadd.xlane.f32.xlu0 %v989_v23 }
 0x85f   :  { %1008 = vrot.lane.b32.xlu0 %v1813_v50, %s1555_s15 }
 0x8ce   :  { %v988_v24 = vpop.xlane.xlu0 %987 }
 0x8cf   :  { %1435 = vrcp.f32 %v988_v24 }
 0x8d2   :  { %v991_v25 = vpop.xlane.xlu0 %990 }
 0x8d3   :  { %1437 = vrcp.f32 %v991_v25 }
 0x8d6   :  { %v1009_v26 = vpop.permute.xlu0 %1008 }
 0x8d7   :  { %1361 = vmatpush3.bf16.msra.mxu1 %v1009_v26 }
 0x8d8   :  { %1374 = vmatprep.subr.bf16.mxu1 %v1552_v0 }
 0x8dc   :  { %v1436_v28 = vpop.eup %1435 }
 0x8dd   :  { %v993_v35 = vmul.f32 %v1436_v28, %v1432_v21 }
 0x8df   :  { %998 = vrot.lane.b32.xlu1 %v993_v35, %s1558_s22 }
 0x8e0   :  { %v1438_v50 = vpop.eup %1437 }
 0x8e1   :  { %v995_v29 = vmul.f32 %v1438_v50, %v1434_v22 }
 0x8e3   :  { %1000 = vrot.lane.b32.xlu1 %v995_v29, %s1558_s22  ;;  %v1007_v31 = vpack.c.bf16 %v995_v29, %v993_v35 }
 0x8e5   :  { %1363 = vmatmul.mubr.msk.bf16.vlgmr.msra.gmra.mxu1 %vm601_vm14, %v1007_v31 }
 0x8e6   :  { %1375 = vmatpush3.bf16.msra.mxu1 %v1411_v30  ;;  %1378 = vmatprep.mubr.msk.bf16.mxu1 %vm1553_vm0, %v1552_v0 }
 0x8e7   :  { %1376 = vmatprep.subr.bf16.mxu1 %v1552_v0 }
 0x8ea   :  { %1377 = vmatpush3.bf16.msra.mxu1 %v1412_v32 }
 0x8ed   :  { %1379 = vmatmul.mubr.msk.bf16.vlgmr.msra.gmra.mxu1 %vm164_vm2, %v874_v6 }
 0x951   :  { %v999_v37 = vpop.permute.xlu1 %998 }
 0x952   :  { %1005 = vst.msk [vmem:[#allocation9] sm:$0xff] %vm1004_vm9, %v999_v37 }
 0x955   :  { %v1001_v33 = vpop.permute.xlu1 %1000 }
 0x956   :  { %1006 = vst.msk [vmem:[#allocation9 + $0x8] sm:$0xff] %vm1004_vm9, %v1001_v33 }
 0x9a5   :  { %v1048_v34 = vpop.f32.mrf.mxu1 }
 0x9a7   :  { %v1364_v38 = vpop.f32.mrf.mxu1 }
 0x9a9   :  { %v1051_v39 = vpop.f32.mrf.mxu1 }
 0x9aa   :  { %v1055_v40 = vpack.c.bf16 %v1051_v39, %v1048_v34 }
 0x9ab   :  { %v1365_v41 = vpop.f32.mrf.mxu1 }
 0x9ac   :  { %1371 = vmatmul.mubr.msk.bf16.vlgmr.msra.gmra.mxu0 %vm164_vm2, %v1055_v40 }
 0x9ad   :  { %v1161_v0 = vpop.f32.mrf.mxu1 }
 0x9af   :  { %v1380_v42 = vpop.f32.mrf.mxu1 }
 0x9b1   :  { %v1164_v43 = vpop.f32.mrf.mxu1 }
 0x9b3   :  { %v1381_v44 = vpop.f32.mrf.mxu1 }
 0x9b4   :  { %1510 = shalt.err (!%p1507_p5)
}
 0x9b5   :  { %s1560_s12 = smov 128   ;;  %s1561_s13 = smov 8  }
 0x9b6   :  { %1193 = dma.vmem_to_hbm [thread:$0]  %s1188_s30, 256, %s1920_s11, [#allocation10], %s1560_s12, %s1560_s12, %s1561_s13  }
 0x9b7   :  { %s1562_s14 = smov [#allocation8]  }
 0x9b8   :  { %s1175_s15 = sshll.u32 %s1562_s14, 4  ;;  %s1176_s15 = int_to_ptr.vmem [resolvable:$true] %s1175_s15 }
 0x9b9   :  { %s1519_s0 = scalar_lea.vmem %s1176_s15, 256  ;;  %p1524_p7 = scmp.lt.s32.totalorder %s1176_s15, %s1176_s15 }
 0x9ba   :  { %p1520_p6 = scmp.ne.s32.totalorder %s1176_s15, %s1519_s0  ;;  %p1525_p8 = scmp.lt.s32.totalorder %s1519_s0, %s1519_s0 }
 0x9bc   :  { %p1526_p9 = por %p1525_p8, %p1524_p7 }
 0x9be   :  { %p1527_p10 = pnand %p1526_p9, %p1520_p6 }
 0xa6c   :  { %v1105_v2 = vpop.f32.mrf.mxu0 }
 0xa6d   :  { %v1162_v45 = vadd.f32 %v1161_v0, %v1105_v2 }
 0xa6e   :  { %v1372_v46 = vpop.f32.mrf.mxu0 }
 0xa6f   :  { %1168 = vst.msk [vmem:[#allocation8] sm:$0xff] %vm116_vm1, %v1162_v45 }
 0xa70   :  { %v1108_v47 = vpop.f32.mrf.mxu0 }
 0xa71   :  { %v1165_v48 = vadd.f32 %v1164_v43, %v1108_v47 }
 0xa72   :  { %v1373_v49 = vpop.f32.mrf.mxu0 }
 0xa73   :  { %1169 = vst.msk [vmem:[#allocation8 + $0x8] sm:$0xff] %vm116_vm1, %v1165_v48 }
 0xa74   :  { %1530 = shalt.err (!%p1527_p10)
}
 0xa75   :  { %1181 = dma.vmem_to_hbm [thread:$0]  %s1176_s15, 256, %s1919_s10, [#allocation4], %s1560_s12, %s1560_s12, %s1561_s13  }
 0xa76   :  { %1543 = dma.done.wait [#allocation4], 256  }
 0xa77   :  { %1544 = vsyncadd [#allocation4], 4294967040 }
 0xa78   :  { %1545 = dma.done.wait [#allocation10], 256  }
 0xa79   :  { %1546 = vsyncadd [#allocation10], 4294967040 }
 0xa7a   :  { %1200 = vsyncpa [#allocation3], 1 }
 0xa7b   :  { %1201 = vsyncpa [#allocation6], 1 }
 0xa7c   :  { %1202 = vsyncpa [#allocation4], 1 }
 0xa7d   :  { %1203 = vsyncpa [#allocation10], 1 }

</bundles_post_ra>
